<compile_context>
chip_gen: v7x
topology: tpu7x:2x2x1
jax: 0.10.0
libtpu: 0.0.40
codegen_flags: <defaults>
</compile_context>

<pallas_src>
import jax
import jax.numpy as jnp
from jax import lax
from jax.experimental import pallas as pl
from jax.experimental.pallas import tpu as pltpu


def _round_up(n, m):
    return ((n + m - 1) // m) * m


def _cdiv(a, b):
    return (a + b - 1) // b


def _log_sigmoid(x):
    # Matches torch.nn.LogSigmoid: logsigmoid(x) = min(x, 0) - log1p(exp(-|x|))
    return jnp.minimum(x, 0.0) - jnp.log1p(jnp.exp(-jnp.abs(x)))


def _make_disch_kernel(H, tb, cb):
    n_chunks = tb // cb

    def kernel(xT_ref, w1_ref, b1_ref, w2_ref, b2_ref, oT_ref):
        # Resident weights (constant-index blocks); loaded once per grid step.
        w1 = w1_ref[...]                                   # (H, 3)
        w2 = w2_ref[...]                                   # (1, H)
        b2 = b2_ref[0, 0]                                  # scalar (SMEM)
        # Hoist the bias lane-broadcast out of the chunk loop (JAX does not
        # CSE broadcast_in_dim inside the unrolled loop).
        b1 = jnp.broadcast_to(b1_ref[...], (H, cb))        # (H, cb)

        def compute_chunk(start):
            x_c = xT_ref[:, pl.ds(start, cb)]              # (3, cb)
            # Hidden layer on the MXU: (H,3) x (3,cb) -> (H,cb).
            h = jnp.dot(w1, x_c, preferred_element_type=jnp.float32,
                        precision=lax.Precision.HIGHEST) + b1
            h = _log_sigmoid(h)                            # EUP: exp + log1p
            # Output layer on the MXU: (1,H) x (H,cb) -> (1,cb).
            o = jnp.dot(w2, h, preferred_element_type=jnp.float32,
                        precision=lax.Precision.HIGHEST) + b2
            oT_ref[:, pl.ds(start, cb)] = o.astype(oT_ref.dtype)

        if n_chunks == 1:
            compute_chunk(0)
        else:
            def body(c, carry):
                compute_chunk(pl.multiple_of(c * cb, cb))
                return carry
            lax.fori_loop(0, n_chunks, body, 0, unroll=True)

    return kernel


def _choose_tiles(B, tile_b, chunk_b):
    """Pick (tile, chunk): lane-aligned, >=2 grid steps when possible (v7x)."""
    tb_full = _round_up(B, 128)                       # one tile covers it all
    tb = min(_round_up(max(tile_b, 1), 128), tb_full)
    if tb_full > 128:
        # Guarantee >= 2 grid steps so both v7x TensorCores get work
        # (no effect on single-TC v5e/v6e).
        tb = min(tb, max(_round_up(_cdiv(B, 2), 128), 128))
    cb = min(_round_up(max(chunk_b, 1), 128), tb)
    tb = _round_up(tb, cb)                            # tile is chunk-divisible
    return tb, cb


def disch_forward_t(xT, w_hidden, b_hidden, w_out, b_out, *,
                    tile_b=16384, chunk_b=512):
    """Forward pass of `Disch` on a lane-dense, already-transposed input.

    xT       : (3, B)  -- features-major input (batch on lanes)
    w_hidden : (H, 3)  -- nn.Linear(3, H).weight
    b_hidden : (H,)    -- nn.Linear(3, H).bias
    w_out    : (1, H)  -- nn.Linear(H, 1).weight
    b_out    : (1,)    -- nn.Linear(H, 1).bias
    returns  : (B, 1)  f32
    """
    _, B = xT.shape
    H = w_hidden.shape[0]

    xT = xT.astype(jnp.float32)
    w1 = w_hidden.astype(jnp.float32)                  # (H, 3)
    b1 = b_hidden.astype(jnp.float32).reshape(H, 1)    # (H, 1)
    w2 = w_out.astype(jnp.float32).reshape(1, H)       # (1, H)
    b2 = b_out.astype(jnp.float32).reshape(1, 1)       # (1, 1) -> SMEM

    tb, cb = _choose_tiles(B, tile_b, chunk_b)
    grid = (_cdiv(B, tb),)   # ragged tail handled by Pallas OOB masking

    out = pl.pallas_call(
        _make_disch_kernel(H, tb, cb),
        out_shape=jax.ShapeDtypeStruct((1, B), jnp.float32),
        grid=grid,
        in_specs=[
            pl.BlockSpec((3, tb), lambda i: (0, i)),               # x tiles
            pl.BlockSpec((H, 3), lambda i: (0, 0)),                # w1 resident
            pl.BlockSpec((H, 1), lambda i: (0, 0)),                # b1 resident
            pl.BlockSpec((1, H), lambda i: (0, 0)),                # w2 resident
            pl.BlockSpec(memory_space=pltpu.MemorySpace.SMEM),     # b2 scalar
        ],
        out_specs=pl.BlockSpec((1, tb), lambda i: (0, i)),         # lane-dense
        compiler_params=pltpu.CompilerParams(
            dimension_semantics=("parallel",),
        ),
        cost_estimate=pl.CostEstimate(
            flops=int(8 * H * B),
            transcendentals=int(2 * H * B),
            bytes_accessed=int(16 * B),
        ),
    )(xT, w1, b1, w2, b2)

    return out.reshape(B, 1)


def disch_forward(x, w_hidden, b_hidden, w_out, b_out, *,
                  tile_b=16384, chunk_b=512):
    """Forward pass of `Disch` with the PyTorch (B, 3) input layout.

    The (B,3)->(3,B) transpose is layout plumbing done by XLA; producers that
    can emit x directly in (3, B) layout should call `disch_forward_t` and
    skip this extra HBM pass.
    """
    # TODO(synk): if the upstream producer can emit (3, B) directly, drop this
    # transpose (one full extra HBM read+write of x).
    xT = x.astype(jnp.float32).T
    return disch_forward_t(xT, w_hidden, b_hidden, w_out, b_out,
                           tile_b=tile_b, chunk_b=chunk_b)


def _reference(x, w_hidden, b_hidden, w_out, b_out):
    h = _log_sigmoid(
        jnp.dot(x, w_hidden.T, precision=lax.Precision.HIGHEST) + b_hidden)
    return jnp.dot(h, w_out.T, precision=lax.Precision.HIGHEST) + b_out


if __name__ == "__main__":
    hidden_dim = 32
    batch = 8

    key = jax.random.PRNGKey(0)
    k_x, k_w1, k_b1, k_w2, k_b2, k_x2, k_x3 = jax.random.split(key, 7)

    # Deterministic parameter init (PyTorch nn.Linear layouts & uniform bounds).
    bound1 = 1.0 / jnp.sqrt(3.0)
    bound2 = 1.0 / jnp.sqrt(float(hidden_dim))
    w_hidden = jax.random.uniform(k_w1, (hidden_dim, 3), jnp.float32, -bound1, bound1)
    b_hidden = jax.random.uniform(k_b1, (hidden_dim,), jnp.float32, -bound1, bound1)
    w_out = jax.random.uniform(k_w2, (1, hidden_dim), jnp.float32, -bound2, bound2)
    b_out = jax.random.uniform(k_b2, (1,), jnp.float32, -bound2, bound2)

    # Small-batch case (single tile, single chunk).
    x = jax.random.normal(k_x, (batch, 3), jnp.float32)
    out = jax.block_until_ready(disch_forward(x, w_hidden, b_hidden, w_out, b_out))
    ref = _reference(x, w_hidden, b_hidden, w_out, b_out)
    assert out.shape == (batch, 1)
    assert jnp.allclose(out, ref, atol=1e-5, rtol=1e-5)

    # Multi-tile + ragged-tail case (grid of 3, last tile only 44/128 valid).
    x2 = jax.random.normal(k_x2, (300, 3), jnp.float32)
    out2 = jax.block_until_ready(
        disch_forward(x2, w_hidden, b_hidden, w_out, b_out, tile_b=128, chunk_b=128)
    )
    ref2 = _reference(x2, w_hidden, b_hidden, w_out, b_out)
    assert out2.shape == (300, 1)
    assert jnp.allclose(out2, ref2, atol=1e-5, rtol=1e-5)

    # Larger case via the lane-dense entry point: exercises the 2-step grid
    # split (v7x 2-TC path) and the unrolled inner chunk loop + ragged tail.
    x3T = jax.random.normal(k_x3, (3, 3000), jnp.float32)
    out3 = jax.block_until_ready(
        disch_forward_t(x3T, w_hidden, b_hidden, w_out, b_out)
    )
    ref3 = _reference(x3T.T, w_hidden, b_hidden, w_out, b_out)
    assert out3.shape == (3000, 1)
    assert jnp.allclose(out3, ref3, atol=1e-5, rtol=1e-5)

    print("KERNEL_OK")
</pallas_src>

<mosaic_0001>
module attributes {stable_mosaic.version = 11 : i64} {
  func.func @kernel(%arg0: i32, %arg1: memref<3x128xf32, #tpu.memory_space<vmem>>, %arg2: memref<32x3xf32, #tpu.memory_space<vmem>>, %arg3: memref<32x1xf32, #tpu.memory_space<vmem>>, %arg4: memref<1x32xf32, #tpu.memory_space<vmem>>, %arg5: memref<1x1xf32, #tpu.memory_space<smem>>, %arg6: memref<1x128xf32, #tpu.memory_space<vmem>>) attributes {dimension_semantics = [#tpu.dimension_semantics<parallel>], iteration_bounds = array<i64: 1>, scalar_prefetch = 0 : i64, scratch_operands = 0 : i64, tpu.core_type = #tpu.core_type<tc>, window_params = [{transform_indices = @transform_0, window_bounds = array<i64: 3, 128>}, {pipeline_mode = #tpu.pipeline_mode<synchronous>, transform_indices = @transform_1, window_bounds = array<i64: 32, 3>}, {pipeline_mode = #tpu.pipeline_mode<synchronous>, transform_indices = @transform_2, window_bounds = array<i64: 32, 1>}, {pipeline_mode = #tpu.pipeline_mode<synchronous>, transform_indices = @transform_3, window_bounds = array<i64: 1, 32>}, {transform_indices = @transform_4, window_bounds = array<i64: 1, 1>}, {transform_indices = @transform_5, window_bounds = array<i64: 1, 128>}]} {
    %c0 = arith.constant 0 : index
    %c0_0 = arith.constant 0 : index
    %0 = vector.load %arg2[%c0, %c0_0] : memref<32x3xf32, #tpu.memory_space<vmem>>, vector<32x3xf32>
    %c0_1 = arith.constant 0 : index
    %c0_2 = arith.constant 0 : index
    %1 = vector.load %arg4[%c0_1, %c0_2] : memref<1x32xf32, #tpu.memory_space<vmem>>, vector<1x32xf32>
    %c0_3 = arith.constant 0 : index
    %c0_4 = arith.constant 0 : index
    %2 = memref.load %arg5[%c0_3, %c0_4] : memref<1x1xf32, #tpu.memory_space<smem>>
    %c0_5 = arith.constant 0 : index
    %c0_6 = arith.constant 0 : index
    %3 = vector.load %arg3[%c0_5, %c0_6] : memref<32x1xf32, #tpu.memory_space<vmem>>, vector<32x1xf32>
    %4 = vector.shape_cast %3 : vector<32x1xf32> to vector<32x1xf32>
    %5 = vector.broadcast %4 : vector<32x1xf32> to vector<32x128xf32>
    %c0_7 = arith.constant 0 : index
    %c0_8 = arith.constant 0 : index
    %6 = vector.load %arg1[%c0_7, %c0_8] : memref<3x128xf32, #tpu.memory_space<vmem>>, vector<3x128xf32>
    %cst = arith.constant dense<0.000000e+00> : vector<32x128xf32>
    %7 = tpu.matmul %0, %6, %cst {dimension_numbers = #tpu.dot_dimension_numbers<[1], [0], [0], [1], [0, 0, 1, 1], [], []>, precision = #tpu.contract_precision<fp32>} : vector<32x3xf32>, vector<3x128xf32>, vector<32x128xf32> -> vector<32x128xf32>
    %8 = arith.addf %7, %5 : vector<32x128xf32>
    %cst_9 = arith.constant 0.000000e+00 : f32
    %9 = vector.broadcast %cst_9 : f32 to vector<32x128xf32>
    %10 = arith.minimumf %8, %9 : vector<32x128xf32>
    %11 = math.absf %8 : vector<32x128xf32>
    %cst_10 = arith.constant 0.000000e+00 : f32
    %12 = vector.broadcast %cst_10 : f32 to vector<32x128xf32>
    %13 = arith.subf %12, %11 : vector<32x128xf32>
    %14 = math.exp %13 : vector<32x128xf32>
    %15 = math.log1p %14 : vector<32x128xf32>
    %16 = arith.subf %10, %15 : vector<32x128xf32>
    %cst_11 = arith.constant dense<0.000000e+00> : vector<1x128xf32>
    %17 = tpu.matmul %1, %16, %cst_11 {dimension_numbers = #tpu.dot_dimension_numbers<[1], [0], [0], [1], [0, 0, 1, 1], [], []>, precision = #tpu.contract_precision<fp32>} : vector<1x32xf32>, vector<32x128xf32>, vector<1x128xf32> -> vector<1x128xf32>
    %18 = vector.broadcast %2 : f32 to vector<1x128xf32>
    %19 = arith.addf %17, %18 : vector<1x128xf32>
    %c0_12 = arith.constant 0 : index
    %c0_13 = arith.constant 0 : index
    %20 = vector.load %arg6[%c0_12, %c0_13] : memref<1x128xf32, #tpu.memory_space<vmem>>, vector<1x128xf32>
    tpu.vector_store %arg6[%c0_12, %c0_13], %19 {strides = array<i32>} : memref<1x128xf32, #tpu.memory_space<vmem>>, vector<1x128xf32>,
    return
  }
  func.func @transform_0(%arg0: i32) -> (i32, i32) {
    %c0_i32 = arith.constant 0 : i32
    %c0_i32_0 = arith.constant 0 : i32
    return %c0_i32, %arg0 : i32, i32
  }
  func.func @transform_1(%arg0: i32) -> (i32, i32) {
    %c0_i32 = arith.constant 0 : i32
    %c0_i32_0 = arith.constant 0 : i32
    %c0_i32_1 = arith.constant 0 : i32
    return %c0_i32, %c0_i32_0 : i32, i32
  }
  func.func @transform_2(%arg0: i32) -> (i32, i32) {
    %c0_i32 = arith.constant 0 : i32
    %c0_i32_0 = arith.constant 0 : i32
    %c0_i32_1 = arith.constant 0 : i32
    return %c0_i32, %c0_i32_0 : i32, i32
  }
  func.func @transform_3(%arg0: i32) -> (i32, i32) {
    %c0_i32 = arith.constant 0 : i32
    %c0_i32_0 = arith.constant 0 : i32
    %c0_i32_1 = arith.constant 0 : i32
    return %c0_i32, %c0_i32_0 : i32, i32
  }
  func.func @transform_4(%arg0: i32) -> (i32, i32) {
    %c0_i32 = arith.constant 0 : i32
    %c0_i32_0 = arith.constant 0 : i32
    %c0_i32_1 = arith.constant 0 : i32
    return %c0_i32, %c0_i32_0 : i32, i32
  }
  func.func @transform_5(%arg0: i32) -> (i32, i32) {
    %c0_i32 = arith.constant 0 : i32
    %c0_i32_0 = arith.constant 0 : i32
    return %c0_i32, %arg0 : i32, i32
  }
}

</mosaic_0001>

<bundles_post_ra>
// kernel: tpu_custom_call.1
= control target key start
LH: loop header
LB: loop body
LE: loop exit
PB: predicated region body
PF: predicated region fallthrough
CT: control target
= control target key end

     0   :  { %vm66_vm0 = vcmask 1042432   ;;  %vm53_vm1 = vcmask 23552   ;;  %v1502_v12 = vmov 0   ;;  %s1668_s0 = inlined_call_operand.vmem [shape: f32[3,8], index: 0, kind: input, shape index: {}]   ;;  %s1669_s1 = inlined_call_operand.vmem [shape: f32[32,3], index: 1, kind: input, shape index: {}]   ;;  %s1670_s2 = inlined_call_operand.vmem [shape: f32[32,1], index: 2, kind: input, shape index: {}]   ;;  %s1671_s3 = inlined_call_operand.vmem [shape: f32[1,32], index: 3, kind: input, shape index: {}]   ;;  %s1672_s4 = inlined_call_operand.<no memory space> [shape: f32[1,1], index: 4, kind: input, shape index: {}]   ;;  %s1673_s5 = inlined_call_operand.hbm [shape: f32[1,8], index: 5, kind: output, shape index: {}]  }
   0x1   :  { %v52_v0 = vld [vmem:[%s1668_s0] sm:$0x7]  ;;  %v23_v2 = vld [vmem:[%s1669_s1 + $0x8] sm:$0xff]  ;;  %v24_v6 = vld [vmem:[%s1669_s1 + $0x10] sm:$0xff]  ;;  %1460 = vset.pattern.permute.xlu0 %v1502_v12  ;;  %1461 = vset.pattern.permute.xlu1 %v1502_v12 }
   0x2   :  { %v22_v1 = vld [vmem:[%s1669_s1] sm:$0xff]  ;;  %v68_v3 = vsel %vm66_vm0, %v52_v0, 0  ;;  %v58_v5 = vsel %vm53_vm1, %v23_v2, 0  ;;  %v25_v7 = vld [vmem:[%s1669_s1 + $0x18] sm:$0xff]  ;;  %v61_v11 = vsel %vm53_vm1, %v24_v6, 0  ;;  %v30_v14 = vld [vmem:[%s1670_s2 + $0x10] sm:$0xff] }
   0x3   :  { %v55_v4 = vsel %vm53_vm1, %v22_v1, 0  ;;  %v1554_v8 = vand.u32 4294901760, %v68_v3  ;;  %v1558_v10 = vand.u32 4294901760, %v58_v5  ;;  %v28_v13 = vld [vmem:[%s1670_s2] sm:$0xff]  ;;  %v1567_v15 = vand.u32 4294901760, %v61_v11  ;;  %44 = vperm.xlu1 %1461, %v30_v14  }
   0x4   :  { %v1556_v9 = vand.u32 4294901760, %v55_v4  ;;  %v64_v16 = vsel %vm53_vm1, %v25_v7, 0  ;;  %34 = vperm.xlu0 %1460, %v28_v13  }
   0x5   :  { %11 = vsyncpa [#allocation4], 0  ;;  %1270 = vmatprep.subr.mxu0 %v1554_v8  ;;  %v147_v18 = vsub.f32 %v58_v5, %v1558_v10  ;;  %v178_v19 = vsub.f32 %v68_v3, %v1554_v8  ;;  %v166_v20 = vand.u32 4294901760, %v64_v16  ;;  %v29_v21 = vld [vmem:[%s1670_s2 + $0x8] sm:$0xff]  ;;  %v31_v22 = vld [vmem:[%s1670_s2 + $0x18] sm:$0xff]  ;;  %v157_v23 = vsub.f32 %v61_v11, %v1567_v15  ;;  %s1506_s11 = smov [#allocation3]  }
   0x6   :  { %v137_v17 = vsub.f32 %v55_v4, %v1556_v9  ;;  %1271 = vmatpush3.msra.mxu0 %v1554_v8  ;;  %v1503_v40 = vmov 0.0|0.0   ;;  %vm1504_vm2 = vmmov 0   ;;  %v1505_v41 = vmov 0.0   ;;  %v26_v6 = vld [vmem:[%s1671_s3] sm:$0x1]  ;;  %s1202_s12 = sshll.u32 %s1506_s11, 4  ;;  %s1203_s12 = int_to_ptr.vmem [resolvable:$true] %s1202_s12 }
   0x7   :  { %v148_v25 = vand.u32 4294901760, %v147_v18  ;;  %v179_v26 = vand.u32 4294901760, %v178_v19  ;;  %v167_v27 = vsub.f32 %v64_v16, %v166_v20  ;;  %v158_v28 = vand.u32 4294901760, %v157_v23  ;;  %49 = vperm.xlu1 %1461, %v31_v22   ;;  %1384 = vmatprep.subr.bf16.mxu1 %v1503_v40  ;;  %s1478_s13 = scalar_lea.vmem %s1203_s12, 16  ;;  %s1482_s14 = scalar_lea.vmem %s1203_s12, 32 }
   0x8   :  { %v138_v24 = vand.u32 4294901760, %v137_v17  ;;  %39 = vperm.xlu0 %1460, %v29_v21   ;;  %1326 = vmatprep.mubr.msk.f32.mxu1 %vm1504_vm2, %v1505_v41  ;;  %vm706_vm3 = vcmask 261120   ;;  %p1479_p0 = scmp.ne.s32.totalorder %s1203_s12, %s1478_s13  ;;  %p1483_p1 = scmp.lt.s32.totalorder %s1203_s12, %s1203_s12 }
   0x9   :  { %v149_v30 = vsub.f32 %v147_v18, %v148_v25  ;;  %v180_v31 = vsub.f32 %v178_v19, %v179_v26  ;;  %v168_v32 = vand.u32 4294901760, %v167_v27  ;;  %v159_v33 = vsub.f32 %v157_v23, %v158_v28  ;;  %p1484_p2 = scmp.lt.s32.totalorder %s1482_s14, %s1478_s13 }
   0xa   :  { %v139_v29 = vsub.f32 %v137_v17, %v138_v24  ;;  %v708_v12 = vsel %vm706_vm3, %v26_v6, 0 }
   0xb   :  { %v150_v35 = vand.u32 4294901760, %v149_v30  ;;  %v181_v36 = vand.u32 4294901760, %v180_v31  ;;  %v169_v37 = vsub.f32 %v167_v27, %v168_v32  ;;  %v160_v38 = vand.u32 4294901760, %v159_v33  ;;  %p1485_p3 = por %p1484_p2, %p1483_p1 }
   0xc   :  { %v140_v34 = vand.u32 4294901760, %v139_v29  ;;  %v1613_v14 = vand.u32 4294901760, %v708_v12 }
   0xd   :  { %1278 = vmatprep.subr.mxu0 %v181_v36  ;;  %v170_v39 = vand.u32 4294901760, %v169_v37  ;;  %p1486_p4 = pnand %p1485_p3, %p1479_p0 }
   0xe   :  { %1272 = vmatprep.mubr.f32.mxu0 %v140_v34 }
   0xf   :  { %1273 = vmatmul.mubr.f32.vlgmr.msra.gmra.mrb[0].mxu0 %v150_v35 }
  0x10   :  { %1279 = vmatpush3.msra.mxu0 %v181_v36  ;;  %1275 = vmatprep.mubr.f32.mxu0 %v160_v38 }
  0x11   :  { %1286 = vmatprep.subr.mxu0 %v178_v19 }
  0x13   :  { %1276 = vmatmul.mubr.f32.gmra.mrb[2].mxu0 %v170_v39 }
  0x14   :  { %1280 = vmatprep.mubr.f32.mxu0 %v1556_v9 }
  0x17   :  { %1281 = vmatmul.mubr.f32.vlgmr.msra.gmra.mrb[0].mxu0 %v1558_v10 }
  0x18   :  { %1287 = vmatpush3.msra.mxu0 %v178_v19  ;;  %1283 = vmatprep.mubr.f32.mxu0 %v1567_v15 }
  0x19   :  { %1294 = vmatprep.subr.mxu0 %v1554_v8 }
  0x1b   :  { %1284 = vmatmul.mubr.f32.gmra.mrb[2].mxu0 %v166_v20 }
  0x1c   :  { %1288 = vmatprep.mubr.f32.mxu0 %v137_v17 }
  0x1f   :  { %1289 = vmatmul.mubr.f32.vlgmr.msra.gmra.mrb[0].mxu0 %v147_v18 }
  0x20   :  { %1295 = vmatpush3.msra.mxu0 %v1554_v8  ;;  %1291 = vmatprep.mubr.f32.mxu0 %v157_v23  ;;  %v1617_v23 = vsub.f32 %v708_v12, %v1613_v14 }
  0x21   :  { %1302 = vmatprep.subr.mxu0 %v179_v26 }
  0x22   :  { %v781_v38 = vand.u32 4294901760, %v1617_v23 }
  0x23   :  { %1292 = vmatmul.mubr.f32.gmra.mrb[2].mxu0 %v167_v27 }
  0x24   :  { %1296 = vmatprep.mubr.f32.mxu0 %v138_v24 }
  0x27   :  { %1297 = vmatmul.mubr.f32.vlgmr.msra.gmra.mrb[0].mxu0 %v148_v25 }
  0x28   :  { %1303 = vmatpush3.msra.mxu0 %v179_v26  ;;  %1299 = vmatprep.mubr.f32.mxu0 %v158_v28 }
  0x29   :  { %1310 = vmatprep.subr.mxu0 %v1554_v8 }
  0x2b   :  { %1300 = vmatmul.mubr.f32.gmra.mrb[2].mxu0 %v168_v32 }
  0x2c   :  { %1304 = vmatprep.mubr.f32.mxu0 %v1556_v9 }
  0x2f   :  { %1305 = vmatmul.mubr.f32.vlgmr.msra.gmra.mrb[0].mxu0 %v1558_v10 }
  0x30   :  { %1311 = vmatpush3.msra.mxu0 %v1554_v8  ;;  %1307 = vmatprep.mubr.f32.mxu0 %v1567_v15 }
  0x33   :  { %1308 = vmatmul.mubr.f32.gmra.mrb[2].mxu0 %v166_v20 }
  0x34   :  { %1312 = vmatprep.mubr.f32.mxu0 %v1556_v9 }
  0x37   :  { %1313 = vmatmul.mubr.f32.vlgmr.msra.gmra.mrb[0].mxu0 %v1558_v10 }
  0x38   :  { %1315 = vmatprep.mubr.f32.mxu0 %v1567_v15 }
  0x3b   :  { %1316 = vmatmul.mubr.f32.gmra.mrb[2].mxu0 %v166_v20 }
  0x82   :  { %v45_v43 = vpop.permute.xlu1 %44 }
  0x83   :  { %v35_v42 = vpop.permute.xlu0 %34 }
  0x86   :  { %v50_v50 = vpop.permute.xlu1 %49 }
  0x87   :  { %v40_v44 = vpop.permute.xlu0 %39 }
 0x10a   :  { %v1314_v45 = vpop.f32.mrb[0].mxu0 }
 0x10b   :  { %v1598_v46 = vadd.f32 %v1314_v45, %v40_v44  ;;  %v623_v47 = vpop.f32.mrb[1].mxu0 }
 0x10c   :  { %v1600_v48 = vadd.f32 %v623_v47, %v35_v42 }
 0x10d   :  { %v650_v49 = vand.u32 2147483647, %v1598_v46  ;;  %v646_v22 = vmin.f32 %v1598_v46, 0.0 }
 0x10e   :  { %v649_v51 = vand.u32 2147483647, %v1600_v48  ;;  %v1317_v52 = vpop.f32.mrb[2].mxu0  ;;  %v645_v33 = vmin.f32 %v1600_v48, 0.0 }
 0x10f   :  { %v654_v53 = vsub.f32 0.0, %v650_v49  ;;  %v1604_v54 = vadd.f32 %v1317_v52, %v50_v50  ;;  %v635_v55 = vpop.f32.mrb[3].mxu0 }
 0x110   :  { %v653_v56 = vsub.f32 0.0, %v649_v51  ;;  %v1606_v57 = vadd.f32 %v635_v55, %v45_v43 }
 0x111   :  { %v659_v58 = vmul.f32 1.442695, %v654_v53  ;;  %v652_v59 = vand.u32 2147483647, %v1604_v54  ;;  %v648_v43 = vmin.f32 %v1604_v54, 0.0  ;;  %v782_v54 = vsub.f32 %v1617_v23, %v781_v38 }
 0x112   :  { %v657_v60 = vmul.f32 1.442695, %v653_v56  ;;  %v651_v61 = vand.u32 2147483647, %v1606_v57  ;;  %v647_v48 = vmin.f32 %v1606_v57, 0.0 }
 0x113   :  { %1462 = vpow2.f32 %v659_v58  ;;  %v656_v62 = vsub.f32 0.0, %v652_v59  ;;  %v783_v6 = vand.u32 4294901760, %v782_v54 }
 0x114   :  { %1464 = vpow2.f32 %v657_v60  ;;  %v655_v63 = vsub.f32 0.0, %v651_v61 }
 0x115   :  { %v663_v0 = vmul.f32 1.442695, %v656_v62 }
 0x116   :  { %v661_v1 = vmul.f32 1.442695, %v655_v63 }
 0x117   :  { %1466 = vpow2.f32 %v663_v0 }
 0x118   :  { %1468 = vpow2.f32 %v661_v1 }
 0x11d   :  { %v1463_v2 = vpop.eup %1462 }
 0x11e   :  { %v1465_v3 = vpop.eup %1464  ;;  %v674_v4 = vadd.f32 1.0, %v1463_v2  ;;  %v677_v10 = vmul.f32 -0.5, %v1463_v2  ;;  %v680_v16 = vand.u32 2147483647, %v1463_v2 }
 0x11f   :  { %v665_v5 = vadd.f32 1.0, %v1465_v3  ;;  %v668_v13 = vmul.f32 -0.5, %v1465_v3  ;;  %v671_v20 = vand.u32 2147483647, %v1465_v3 }
 0x120   :  { %1470 = vlog2.f32 %v674_v4  ;;  %v678_v15 = vadd.f32 1.0, %v677_v10  ;;  %vm681_vm4 = vcmp.lt.f32.partialorder %v680_v16, 0.0004427343 }
 0x121   :  { %v1467_v7 = vpop.eup %1466  ;;  %1472 = vlog2.f32 %v665_v5  ;;  %v669_v18 = vadd.f32 1.0, %v668_v13  ;;  %vm672_vm5 = vcmp.lt.f32.partialorder %v671_v20, 0.0004427343  ;;  %v705_v20 = vstv %s1672_s4 }
 0x122   :  { %v1469_v8 = vpop.eup %1468  ;;  %v692_v9 = vadd.f32 1.0, %v1467_v7  ;;  %v695_v17 = vmul.f32 -0.5, %v1467_v7  ;;  %v679_v26 = vmul.f32 %v1463_v2, %v678_v15  ;;  %v698_v30 = vand.u32 2147483647, %v1467_v7 }
 0x123   :  { %v683_v11 = vadd.f32 1.0, %v1469_v8  ;;  %v686_v19 = vmul.f32 -0.5, %v1469_v8  ;;  %v670_v29 = vmul.f32 %v1465_v3, %v669_v18  ;;  %v689_v34 = vand.u32 2147483647, %v1469_v8 }
 0x124   :  { %1474 = vlog2.f32 %v692_v9  ;;  %v696_v27 = vadd.f32 1.0, %v695_v17  ;;  %vm699_vm6 = vcmp.lt.f32.partialorder %v698_v30, 0.0004427343 }
 0x125   :  { %1476 = vlog2.f32 %v683_v11  ;;  %v687_v31 = vadd.f32 1.0, %v686_v19  ;;  %vm690_vm7 = vcmp.lt.f32.partialorder %v689_v34, 0.0004427343 }
 0x126   :  { %v697_v45 = vmul.f32 %v1467_v7, %v696_v27 }
 0x127   :  { %v688_v47 = vmul.f32 %v1469_v8, %v687_v31 }
 0x12a   :  { %v1471_v21 = vpop.eup %1470 }
 0x12b   :  { %v1473_v24 = vpop.eup %1472  ;;  %v676_v25 = vmul.f32 0.6931472, %v1471_v21 }
 0x12c   :  { %v667_v28 = vmul.f32 0.6931472, %v1473_v24 }
 0x12d   :  { %v682_v32 = vsel %vm681_vm4, %v679_v26, %v676_v25 }
 0x12e   :  { %v1475_v35 = vpop.eup %1474  ;;  %v702_v36 = vsub.f32 %v646_v22, %v682_v32  ;;  %v673_v37 = vsel %vm672_vm5, %v670_v29, %v667_v28 }
 0x12f   :  { %v1477_v39 = vpop.eup %1476  ;;  %v701_v42 = vsub.f32 %v645_v33, %v673_v37  ;;  %v694_v44 = vmul.f32 0.6931472, %v1475_v35 }
 0x130   :  { %v685_v46 = vmul.f32 0.6931472, %v1477_v39  ;;  %v714_v49 = vand.u32 4294901760, %v702_v36 }
 0x131   :  { %v700_v50 = vsel %vm699_vm6, %v697_v45, %v694_v44  ;;  %v711_v51 = vand.u32 4294901760, %v701_v42 }
 0x132   :  { %v704_v52 = vsub.f32 %v648_v43, %v700_v50  ;;  %v691_v53 = vsel %vm690_vm7, %v688_v47, %v685_v46  ;;  %v798_v55 = vsub.f32 %v702_v36, %v714_v49 }
 0x133   :  { %v703_v56 = vsub.f32 %v647_v48, %v691_v53  ;;  %v1385_v58 = vpack.c.bf16 %v714_v49, %v711_v51  ;;  %v791_v59 = vsub.f32 %v701_v42, %v711_v51 }
 0x134   :  { %v720_v60 = vand.u32 4294901760, %v704_v52  ;;  %v799_v61 = vand.u32 4294901760, %v798_v55 }
 0x135   :  { %1386 = vmatpush3.bf16.msra.mxu1 %v1385_v58  ;;  %v717_v62 = vand.u32 4294901760, %v703_v56  ;;  %v792_v63 = vand.u32 4294901760, %v791_v59  ;;  %v1397_v0 = vpack.c.bf16 %v798_v55, %v791_v59 }
 0x136   :  { %1387 = vmatprep.subr.bf16.mxu1 %v1503_v40  ;;  %v812_v57 = vsub.f32 %v704_v52, %v720_v60  ;;  %v800_v1 = vsub.f32 %v798_v55, %v799_v61 }
 0x137   :  { %v1388_v2 = vpack.c.bf16 %v720_v60, %v717_v62  ;;  %v805_v3 = vsub.f32 %v703_v56, %v717_v62  ;;  %v793_v4 = vsub.f32 %v791_v59, %v792_v63  ;;  %v1409_v5 = vpack.c.bf16 %v799_v61, %v792_v63 }
 0x138   :  { %v801_v7 = vand.u32 4294901760, %v800_v1  ;;  %v813_v8 = vand.u32 4294901760, %v812_v57 }
 0x139   :  { %1389 = vmatpush3.bf16.msra.mxu1 %v1388_v2  ;;  %v794_v9 = vand.u32 4294901760, %v793_v4  ;;  %v806_v10 = vand.u32 4294901760, %v805_v3  ;;  %v1400_v11 = vpack.c.bf16 %v812_v57, %v805_v3 }
 0x13a   :  { %1390 = vmatprep.subr.bf16.mxu1 %v1503_v40  ;;  %v814_v12 = vsub.f32 %v812_v57, %v813_v8 }
 0x13b   :  { %v1391_v13 = vpack.c.bf16 %v801_v7, %v794_v9  ;;  %v807_v15 = vsub.f32 %v805_v3, %v806_v10  ;;  %v1412_v16 = vpack.c.bf16 %v813_v8, %v806_v10 }
 0x13c   :  { %1327 = vmatmul.mubr.f32.vlgmr.msra.gmra.mrb[0].mxu1 %v783_v6  ;;  %v815_v17 = vand.u32 4294901760, %v814_v12 }
 0x13d   :  { %1392 = vmatpush3.bf16.msra.mxu1 %v1391_v13  ;;  %v808_v18 = vand.u32 4294901760, %v807_v15  ;;  %1337 = vmatprep.mubr.msk.f32.mxu1 %vm1504_vm2, %v1505_v41 }
 0x13e   :  { %1393 = vmatprep.subr.bf16.mxu1 %v1503_v40 }
 0x13f   :  { %v1394_v19 = vpack.c.bf16 %v815_v17, %v808_v18 }
 0x141   :  { %1395 = vmatpush3.bf16.msra.mxu1 %v1394_v19 }
 0x142   :  { %1396 = vmatprep.subr.bf16.mxu1 %v1503_v40 }
 0x144   :  { %1338 = vmatmul.mubr.f32.vlgmr.msra.gmra.mrb[0].mxu1 %v1613_v14 }
 0x145   :  { %1398 = vmatpush3.bf16.msra.mxu1 %v1397_v0  ;;  %1348 = vmatprep.mubr.msk.f32.mxu1 %vm1504_vm2, %v1505_v41 }
 0x146   :  { %1399 = vmatprep.subr.bf16.mxu1 %v1503_v40 }
 0x149   :  { %1401 = vmatpush3.bf16.msra.mxu1 %v1400_v11 }
 0x14a   :  { %1402 = vmatprep.subr.bf16.mxu1 %v1503_v40 }
 0x14c   :  { %1349 = vmatmul.mubr.f32.vlgmr.msra.gmra.mrb[0].mxu1 %v1617_v23 }
 0x14d   :  { %1404 = vmatpush3.bf16.msra.mxu1 %v1385_v58  ;;  %1359 = vmatprep.mubr.msk.f32.mxu1 %vm1504_vm2, %v1505_v41 }
 0x14e   :  { %1405 = vmatprep.subr.bf16.mxu1 %v1503_v40 }
 0x151   :  { %1407 = vmatpush3.bf16.msra.mxu1 %v1388_v2 }
 0x152   :  { %1408 = vmatprep.subr.bf16.mxu1 %v1503_v40 }
 0x154   :  { %1360 = vmatmul.mubr.f32.vlgmr.msra.gmra.mrb[0].mxu1 %v781_v38 }
 0x155   :  { %1410 = vmatpush3.bf16.msra.mxu1 %v1409_v5  ;;  %1370 = vmatprep.mubr.msk.f32.mxu1 %vm1504_vm2, %v1505_v41 }
 0x156   :  { %1411 = vmatprep.subr.bf16.mxu1 %v1503_v40 }
 0x159   :  { %1413 = vmatpush3.bf16.msra.mxu1 %v1412_v16 }
 0x15a   :  { %1414 = vmatprep.subr.bf16.mxu1 %v1503_v40 }
 0x15c   :  { %1371 = vmatmul.mubr.f32.vlgmr.msra.gmra.mrb[0].mxu1 %v1613_v14 }
 0x15d   :  { %1416 = vmatpush3.bf16.msra.mxu1 %v1385_v58  ;;  %1381 = vmatprep.mubr.msk.f32.mxu1 %vm1504_vm2, %v1505_v41 }
 0x15e   :  { %1417 = vmatprep.subr.bf16.mxu1 %v1503_v40 }
 0x161   :  { %1419 = vmatpush3.bf16.msra.mxu1 %v1388_v2 }
 0x164   :  { %1382 = vmatmul.mubr.f32.vlgmr.msra.gmra.mrb[0].mxu1 %v1613_v14 }
 0x237   :  { %v1191_v21 = vpop.f32.mrb[0].mxu1 }
 0x238   :  { %v1424_v22 = vadd.f32 %v1191_v21, %v705_v20  ;;  %v1383_v23 = vpop.f32.mrb[1].mxu1 }
 0x23a   :  { %1195 = vst [vmem:[#allocation3] sm:$0x1] %v1424_v22 }
 0x23b   :  { %1489 = shalt.err (!%p1486_p4)
}
 0x23c   :  { %s1490_s17 = scalar_lea.hbm %s1673_s5, 16 }
 0x23d   :  { %p1491_p5 = scmp.ne.s32.totalorder %s1673_s5, %s1490_s17  ;;  %p1494_p6 = scmp.lt.u32.totalorder %s1490_s17, %s1673_s5 }
 0x23f   :  { %p1496_p7 = pnand %p1494_p6, %p1491_p5 }
 0x241   :  { %1499 = shalt.err (!%p1496_p7)
}
 0x242   :  { %1205 = dma.vmem_to_hbm [thread:$0]  %s1203_s12, 16, %s1673_s5, [#allocation4]  }
 0x243   :  { %1500 = dma.done.wait [#allocation4], 16  }
 0x244   :  { %1501 = vsyncadd [#allocation4], 4294967280 }
 0x245   :  { %1209 = vsyncpa [#allocation4], 1 }

</bundles_post_ra>
